<compile_context>
chip_gen: v7x
topology: tpu7x:2x2x1
jax: 0.10.0
libtpu: 0.0.40
codegen_flags: <defaults>
</compile_context>

<pallas_src>
import functools

import jax
import jax.numpy as jnp
from jax.experimental import pallas as pl
from jax.experimental.pallas import tpu as pltpu


# ---------------------------------------------------------------------------
# Helpers shared by the wrapper (kernel operand) and the host reference.
# ---------------------------------------------------------------------------
def dropout_bits(key, shape):
    """Uniform uint32 bits from which the WeightDrop keep-mask is derived."""
    return jax.random.bits(key, shape, dtype=jnp.uint32)


def keep_threshold(drop_p):
    """uint32 threshold t such that P(bits >= t) == 1 - drop_p."""
    assert 0.0 <= drop_p < 1.0, "dropout p must be in [0, 1)"
    return min(int(round(drop_p * 2.0 ** 32)), 2 ** 32 - 1)


def _pick_batch_tile(batch):
    """Largest sublane-aligned tile dividing B that keeps >= 2 grid steps."""
    for tb in (256, 128, 64, 32, 16, 8):
        if batch % tb == 0 and batch // tb >= 2:
            return tb
    return batch


def _cost_estimate(B, I, O, extra_bytes=0):
    bytes_accessed = (B * I + O * I + O + B * O) * 4 + extra_bytes
    return pl.CostEstimate(flops=2 * B * I * O,
                           transcendentals=0,
                           bytes_accessed=bytes_accessed)


# ---------------------------------------------------------------------------
# Fused kernel: WeightDrop._setweights (variational=False) + nn.Linear forward
# ---------------------------------------------------------------------------
def _weight_drop_linear_kernel(x_ref, w_ref, bits_ref, b_ref, o_ref, *,
                               keep_thresh, keep_scale):
    # x_ref: (TB, I), w_ref: (O, I), bits_ref: (O, I) uint32, b_ref: (1, O)
    # Inverted dropout on the weight: keep iff bits >= thresh, scale by 1/(1-p).
    keep = jnp.where(bits_ref[...] >= jnp.uint32(keep_thresh),
                     jnp.float32(keep_scale), jnp.float32(0.0))
    w = (w_ref[...].astype(jnp.float32) * keep).astype(jnp.bfloat16)
    # Wrapped module forward (nn.Linear): y = x @ w.T + b  (contract I with I).
    y = jax.lax.dot_general(
        x_ref[...].astype(jnp.bfloat16), w,
        dimension_numbers=(((1,), (1,)), ((), ())),
        preferred_element_type=jnp.float32,
    )
    o_ref[...] = (y + b_ref[...].astype(jnp.float32)).astype(o_ref.dtype)


def _linear_kernel(x_ref, w_ref, b_ref, o_ref):
    # Eval / p == 0 path: F.dropout is the identity -> plain linear forward.
    y = jax.lax.dot_general(
        x_ref[...].astype(jnp.bfloat16), w_ref[...].astype(jnp.bfloat16),
        dimension_numbers=(((1,), (1,)), ((), ())),
        preferred_element_type=jnp.float32,
    )
    o_ref[...] = (y + b_ref[...].astype(jnp.float32)).astype(o_ref.dtype)


# ---------------------------------------------------------------------------
# WeightDrop(nn.Linear(I, O), ['weight'], dropout=p).forward(x)
# ---------------------------------------------------------------------------
def weight_drop_linear_forward(x, raw_w, bias, *, drop_p, rng_key,
                               training=True, tb=None):
    """Pallas version of WeightDrop.forward for a wrapped nn.Linear.

    Returns y = x @ dropout(raw_w, p, training).T + bias  (shape (B, O)).
    `rng_key` must change per training step to draw a fresh dropout mask.
    """
    B, I = x.shape
    O, I2 = raw_w.shape
    assert I == I2 and bias.shape == (O,)
    tb = _pick_batch_tile(B) if tb is None else tb
    assert B % tb == 0, "batch must be a multiple of the batch tile"

    bias_row = bias.reshape(1, O)                       # lane-dense bias row
    compiler_params = pltpu.CompilerParams(
        dimension_semantics=("parallel",))              # batch axis -> megacore

    if training and drop_p > 0.0:
        bits = dropout_bits(rng_key, (O, I))            # uniform uint32 bits
        kernel = functools.partial(
            _weight_drop_linear_kernel,
            keep_thresh=keep_threshold(drop_p),
            keep_scale=1.0 / (1.0 - drop_p),
        )
        return pl.pallas_call(
            kernel,
            out_shape=jax.ShapeDtypeStruct((B, O), x.dtype),
            grid=(B // tb,),
            in_specs=[
                pl.BlockSpec((tb, I), lambda i: (i, 0)),   # batch tile of x
                pl.BlockSpec((O, I), lambda i: (0, 0)),    # resident raw weight
                pl.BlockSpec((O, I), lambda i: (0, 0)),    # resident mask bits
                pl.BlockSpec((1, O), lambda i: (0, 0)),    # bias row
            ],
            out_specs=pl.BlockSpec((tb, O), lambda i: (i, 0)),
            compiler_params=compiler_params,
            cost_estimate=_cost_estimate(B, I, O, extra_bytes=O * I * 4),
        )(x, raw_w, bits, bias_row)

    return pl.pallas_call(
        _linear_kernel,
        out_shape=jax.ShapeDtypeStruct((B, O), x.dtype),
        grid=(B // tb,),
        in_specs=[
            pl.BlockSpec((tb, I), lambda i: (i, 0)),
            pl.BlockSpec((O, I), lambda i: (0, 0)),
            pl.BlockSpec((1, O), lambda i: (0, 0)),
        ],
        out_specs=pl.BlockSpec((tb, O), lambda i: (i, 0)),
        compiler_params=compiler_params,
        cost_estimate=_cost_estimate(B, I, O),
    )(x, raw_w, bias_row)


if __name__ == "__main__":
    # Small demo shapes: batch=64, in_features=128, out_features=128
    # (lane-dense), weight dropout p=0.5 -- the canonical WeightDrop(Linear)
    # configuration.
    B, I, O = 64, 128, 128
    p = 0.5

    key = jax.random.PRNGKey(0)
    kx, kw, kb, kdrop = jax.random.split(key, 4)
    x = jax.random.normal(kx, (B, I), dtype=jnp.float32)
    raw_w = jax.random.normal(kw, (O, I), dtype=jnp.float32) / jnp.sqrt(I)
    bias = 0.1 * jax.random.normal(kb, (O,), dtype=jnp.float32)

    # ---- training=True: dropout mask applied to the weight, fused linear ----
    y_train = weight_drop_linear_forward(
        x, raw_w, bias, drop_p=p, rng_key=kdrop, training=True)
    y_train = jax.block_until_ready(y_train)
    assert y_train.shape == (B, O)

    # Host reference built from the *same* bits / threshold the kernel uses.
    bits = dropout_bits(kdrop, (O, I))
    keep = jnp.where(bits >= jnp.uint32(keep_threshold(p)),
                     jnp.float32(1.0 / (1.0 - p)), jnp.float32(0.0))
    drop_frac = float(jnp.mean((keep == 0.0).astype(jnp.float32)))
    assert 0.4 < drop_frac < 0.6, f"drop fraction {drop_frac} far from p={p}"

    w_drop = raw_w * keep                       # survivors = raw_w / (1 - p)
    ref_train = x @ w_drop.T + bias
    # Tolerance covers the bf16 cast of the MXU operands (f32 accumulation).
    assert jnp.allclose(y_train, ref_train, atol=5e-2, rtol=5e-2), \
        "train-mode output mismatch"

    # ---- training=False: F.dropout is the identity ----
    y_eval = weight_drop_linear_forward(
        x, raw_w, bias, drop_p=p, rng_key=kdrop, training=False)
    y_eval = jax.block_until_ready(y_eval)
    ref_eval = x @ raw_w.T + bias
    assert jnp.allclose(y_eval, ref_eval, atol=5e-2, rtol=5e-2), \
        "eval-mode output mismatch"

    print("KERNEL_OK")
</pallas_src>

<mosaic_0001>
module attributes {stable_mosaic.version = 11 : i64} {
  func.func @_weight_drop_linear_kernel(%arg0: i32, %arg1: memref<32x128xf32, #tpu.memory_space<vmem>>, %arg2: memref<128x128xf32, #tpu.memory_space<vmem>>, %arg3: memref<128x128xi32, #tpu.memory_space<vmem>>, %arg4: memref<1x128xf32, #tpu.memory_space<vmem>>, %arg5: memref<32x128xf32, #tpu.memory_space<vmem>>) attributes {dimension_semantics = [#tpu.dimension_semantics<parallel>], iteration_bounds = array<i64: 2>, scalar_prefetch = 0 : i64, scratch_operands = 0 : i64, tpu.core_type = #tpu.core_type<tc>, window_params = [{transform_indices = @transform_0, window_bounds = array<i64: 32, 128>}, {pipeline_mode = #tpu.pipeline_mode<synchronous>, transform_indices = @transform_1, window_bounds = array<i64: 128, 128>}, {pipeline_mode = #tpu.pipeline_mode<synchronous>, transform_indices = @transform_2, window_bounds = array<i64: 128, 128>}, {pipeline_mode = #tpu.pipeline_mode<synchronous>, transform_indices = @transform_3, window_bounds = array<i64: 1, 128>}, {transform_indices = @transform_4, window_bounds = array<i64: 32, 128>}]} {
    %c0 = arith.constant 0 : index
    %c0_0 = arith.constant 0 : index
    %0 = vector.load %arg3[%c0, %c0_0] : memref<128x128xi32, #tpu.memory_space<vmem>>, vector<128x128xi32>
    %c-2147483648_i32 = arith.constant -2147483648 : i32
    %1 = vector.broadcast %c-2147483648_i32 : i32 to vector<128x128xi32>
    %2 = arith.cmpi uge, %0, %1 : vector<128x128xi32>
    %cst = arith.constant 2.000000e+00 : f32
    %cst_1 = arith.constant 0.000000e+00 : f32
    %3 = vector.broadcast %cst : f32 to vector<128x128xf32>
    %4 = vector.broadcast %cst_1 : f32 to vector<128x128xf32>
    %5 = arith.select %2, %3, %4 : vector<128x128xi1>, vector<128x128xf32>
    %c0_2 = arith.constant 0 : index
    %c0_3 = arith.constant 0 : index
    %6 = vector.load %arg2[%c0_2, %c0_3] : memref<128x128xf32, #tpu.memory_space<vmem>>, vector<128x128xf32>
    %7 = arith.mulf %6, %5 : vector<128x128xf32>
    %8 = arith.truncf %7 : vector<128x128xf32> to vector<128x128xbf16>
    %c0_4 = arith.constant 0 : index
    %c0_5 = arith.constant 0 : index
    %9 = vector.load %arg1[%c0_4, %c0_5] : memref<32x128xf32, #tpu.memory_space<vmem>>, vector<32x128xf32>
    %10 = arith.truncf %9 : vector<32x128xf32> to vector<32x128xbf16>
    %cst_6 = arith.constant dense<0.000000e+00> : vector<32x128xf32>
    %11 = tpu.matmul %10, %8, %cst_6 {dimension_numbers = #tpu.dot_dimension_numbers<[1], [1], [0], [0], [0, 0, 1, 0], [], []>} : vector<32x128xbf16>, vector<128x128xbf16>, vector<32x128xf32> -> vector<32x128xf32>
    %c0_7 = arith.constant 0 : index
    %c0_8 = arith.constant 0 : index
    %12 = vector.load %arg4[%c0_7, %c0_8] : memref<1x128xf32, #tpu.memory_space<vmem>>, vector<1x128xf32>
    %13 = vector.broadcast %12 : vector<1x128xf32> to vector<32x128xf32>
    %14 = arith.addf %11, %13 : vector<32x128xf32>
    %c0_9 = arith.constant 0 : index
    %c0_10 = arith.constant 0 : index
    %15 = vector.load %arg5[%c0_9, %c0_10] : memref<32x128xf32, #tpu.memory_space<vmem>>, vector<32x128xf32>
    tpu.vector_store %arg5[%c0_9, %c0_10], %14 {strides = array<i32>} : memref<32x128xf32, #tpu.memory_space<vmem>>, vector<32x128xf32>,
    return
  }
  func.func @transform_0(%arg0: i32) -> (i32, i32) {
    %c0_i32 = arith.constant 0 : i32
    %c0_i32_0 = arith.constant 0 : i32
    return %arg0, %c0_i32 : i32, i32
  }
  func.func @transform_1(%arg0: i32) -> (i32, i32) {
    %c0_i32 = arith.constant 0 : i32
    %c0_i32_0 = arith.constant 0 : i32
    %c0_i32_1 = arith.constant 0 : i32
    return %c0_i32, %c0_i32_0 : i32, i32
  }
  func.func @transform_2(%arg0: i32) -> (i32, i32) {
    %c0_i32 = arith.constant 0 : i32
    %c0_i32_0 = arith.constant 0 : i32
    %c0_i32_1 = arith.constant 0 : i32
    return %c0_i32, %c0_i32_0 : i32, i32
  }
  func.func @transform_3(%arg0: i32) -> (i32, i32) {
    %c0_i32 = arith.constant 0 : i32
    %c0_i32_0 = arith.constant 0 : i32
    %c0_i32_1 = arith.constant 0 : i32
    return %c0_i32, %c0_i32_0 : i32, i32
  }
  func.func @transform_4(%arg0: i32) -> (i32, i32) {
    %c0_i32 = arith.constant 0 : i32
    %c0_i32_0 = arith.constant 0 : i32
    return %arg0, %c0_i32 : i32, i32
  }
}

</mosaic_0001>

<bundles_post_ra>
// kernel: tpu_custom_call.1
= control target key start
LH: loop header
LB: loop body
LE: loop exit
PB: predicated region body
PF: predicated region fallthrough
CT: control target
= control target key end

     0   :  { %9 = vsyncpa [#allocation3], 0  ;;  %s1095_s0 = inlined_call_operand.hbm [shape: f32[64,128], index: 0, kind: input, shape index: {}]   ;;  %s1096_s1 = inlined_call_operand.hbm [shape: f32[128,128], index: 1, kind: input, shape index: {}]   ;;  %s1097_s2 = inlined_call_operand.hbm [shape: u32[128,128], index: 2, kind: input, shape index: {}]   ;;  %s1098_s3 = inlined_call_operand.vmem [shape: f32[1,128], index: 3, kind: input, shape index: {}]   ;;  %s1099_s4 = inlined_call_operand.hbm [shape: f32[64,128], index: 4, kind: output, shape index: {}]  }
   0x1   :  { %11 = vsyncpa [#allocation3 + $0x1], 0 }
   0x2   :  { %12 = vsyncpa [#allocation6], 0 }
   0x3   :  { %13 = vsyncpa [#allocation4], 0 }
   0x4   :  { %15 = vsyncpa [#allocation4 + $0x1], 0  ;;  %s823_s15 = smov 0   ;;  %s825_s16 = smov 0  }
   0x5   :  { %s827_s17 = smov 0   ;;  %s829_s18 = smov 0  }
   0x6 LB: > { %s844_s19 = sadd.s32 4294967295, %s787_s18   ;;  %s508_s20 = sadd.s32 4294967294, %s787_s18   ;;  %s787_s18 = sphi %s829_s18, %s1119_s18   ;;  %s783_s17 = sphi %s827_s17, %s1118_s17   ;;  %s779_s16 = sphi %s825_s16, %s1117_s16   ;;  %s775_s15 = sphi %s823_s15, %s1116_s15  }
   0x7   : > { %p41_p0 = scmp.ne.s32.totalorder %s779_s16, %s775_s15  ;;  %p1100_p1 = scmp.eq.s32.totalorder %s844_s19, 0 }
   0x8   : > { %p134_p3 = scmp.eq.s32.totalorder %s508_s20, 1  ;;  %p509_p5 = scmp.ge.s32.totalorder %s787_s18, 1 }
   0x9   : > { %p853_p4 = por %p1100_p1, %p41_p0  ;;  %p141_p7 = scmp.lt.s32.totalorder %s787_s18, 3 }
   0xa   : > { %p858_p6 = por %p134_p3, %p41_p0  ;;  %s789_s24 = smov [#allocation5]  }
   0xb   : > { %s1103_s21 = scalar_select %p853_p4, 1, 0 }
   0xc   : > { %s1104_s22 = scalar_select %p858_p6, 1, 0 }
   0xd   : > { %p863_p8 = pnand %p509_p5, %p141_p7  ;;  %s153_s25 = sshll.u32 %s789_s24, 4  ;;  %s867_s25 = int_to_ptr.vmem [resolvable:$true] %s153_s25 }
   0xe   : > { %s790_s27 = smov [#allocation7]   ;;  %s631_s5 = scalar_lea.hbm %s1096_s1, 2048 }
   0xf   : > { %p571_p9 = pneg %p863_p8  ;;  %s166_s28 = sshll.u32 %s790_s27, 4  ;;  %s878_s28 = int_to_ptr.vmem [resolvable:$true] %s166_s28 }
  0x10   : > { %p632_p12 = scmp.ne.s32.totalorder %s1096_s1, %s631_s5  ;;  %p638_p5 = scmp.lt.u32.totalorder %s631_s5, %s1096_s1 }
  0x11   : > { %p874_p11 = pnand %p571_p9, %p1100_p1 }
  0x13   : > { %p633_p13 = pneg %p874_p11 }
  0x15   : > { %p634_p0 = pnand %p633_p13, %p632_p12 }
  0x17   : > { %p635_p3 = pneg %p634_p0 }
  0x19   : > { %p640_p7 = pnand %p638_p5, %p635_p3 }
  0x1b   : > { %643 = shalt.err (!%p640_p7)
}
  0x1c   : > { %s644_s10 = scalar_lea.vmem %s867_s25, 2048  ;;  %p652_p2 = scmp.lt.s32.totalorder %s867_s25, %s867_s25 }
  0x1d   : > { %p645_p9 = scmp.ne.s32.totalorder %s867_s25, %s644_s10  ;;  %p653_p12 = scmp.lt.s32.totalorder %s644_s10, %s644_s10 }
  0x1f   : > { %p647_p10 = pnand %p645_p9, %p633_p13  ;;  %p654_p0 = por %p653_p12, %p652_p2 }
  0x21   : > { %p648_p1 = pneg %p647_p10 }
  0x23   : > { %p655_p6 = pnand %p654_p0, %p648_p1 }
  0x25   : > { %658 = shalt.err (!%p655_p6)
}
  0x26   : > { %s791_s11 = smov 128   ;;  %s792_s12 = smov 8  }
  0x27   : > { %574 = dma.hbm_to_vmem [thread:$0]  (!%p874_p11), %s1096_s1, 2048, %s867_s25, [#allocation6], %s791_s11, %s791_s11, %s792_s12  }
  0x28   : > { %s659_s27 = scalar_lea.hbm %s1097_s2, 2048 }
  0x29   : > { %p660_p1 = scmp.ne.s32.totalorder %s1097_s2, %s659_s27  ;;  %p666_p10 = scmp.lt.u32.totalorder %s659_s27, %s1097_s2 }
  0x2b   : > { %p662_p2 = pnand %p660_p1, %p633_p13 }
  0x2d   : > { %p663_p6 = pneg %p662_p2 }
  0x2f   : > { %p668_p3 = pnand %p666_p10, %p663_p6 }
  0x31   : > { %671 = shalt.err (!%p668_p3)
}
  0x32   : > { %s672_s25 = scalar_lea.vmem %s878_s28, 2048  ;;  %p680_p12 = scmp.lt.s32.totalorder %s878_s28, %s878_s28 }
  0x33   : > { %p673_p5 = scmp.ne.s32.totalorder %s878_s28, %s672_s25  ;;  %p681_p0 = scmp.lt.s32.totalorder %s672_s25, %s672_s25 }
  0x35   : > { %p675_p7 = pnand %p673_p5, %p633_p13  ;;  %p682_p1 = por %p681_p0, %p680_p12 }
  0x37   : > { %p676_p9 = pneg %p675_p7 }
  0x39   : > { %p683_p2 = pnand %p682_p1, %p676_p9 }
  0x3b   : > { %686 = shalt.err (!%p683_p2)
}
  0x3c   : > { %577 = dma.hbm_to_vmem [thread:$0]  (!%p874_p11), %s1097_s2, 2048, %s878_s28, [#allocation6], %s791_s11, %s791_s11, %s792_s12  }
  0x3d   : > { %s939_s26 = sadd.s32 1, %s787_s18   ;;  %s28_s9 = sadd.s32 1, %s783_s17 }
  0x3e   : > { %s25_s10 = ssub.s32 %s787_s18, %s939_s26  ;;  %p35_p13 = scmp.ne.s32.totalorder %s783_s17, %s779_s16 }
  0x3f   : > { %p26_p6 = scmp.eq.s32.totalorder %s25_s10, 0  ;;  %p36_p10 = scmp.eq.s32.totalorder %s787_s18, 0 }
  0x40   : > { %p1107_p3 = scmp.eq.s32.totalorder %s844_s19, 1  ;;  %p588_p7 = scmp.lt.s32.totalorder %s787_s18, 2 }
  0x41   : > { %s955_s14 = scalar_select %p26_p6, %s783_s17, %s28_s9  }
  0x42   : > { %p949_p5 = por %p1107_p3, %p35_p13  ;;  %p37_p9 = por %p36_p10, %p35_p13 }
  0x43   : > { %s183_s20 = sand.u32 1, %s783_s17   ;;  %s527_s28 = sshll.u32 %s787_s18, 9 }
  0x44   : > { %s1108_s13 = scalar_select %p949_p5, 1, 0 }
  0x45   : > { %s513_s24 = sshll.u32 %s183_s20, 5  ;;  %s962_s30 = scalar_lea.hbm %s1095_s0, %s527_s28 }
  0x46   : > { %s187_s5 = scalar_lea.vmem [#allocation2], %s513_s24  ;;  %p966_p11 = pnand %p588_p7, %p37_p9 }
  0x47   : > { %s194_s6 = sshll.u32 %s187_s5, 4  ;;  %s970_s7 = scalar_lea.sflag [#allocation3], %s183_s20  ;;  %s964_s6 = int_to_ptr.vmem [resolvable:$true] %s194_s6 }
  0x48   : > { %s687_s8 = scalar_lea.hbm %s962_s30, 512  ;;  %p689_p0 = pneg %p966_p11 }
  0x49   : > { %p688_p12 = scmp.ne.s32.totalorder %s962_s30, %s687_s8  ;;  %s692_s24 = scalar_lea.hbm %s1095_s0, 1024 }
  0x4a   : > { %p693_p13 = scmp.lt.u32.totalorder %s962_s30, %s1095_s0  ;;  %p694_p6 = scmp.lt.u32.totalorder %s692_s24, %s687_s8 }
  0x4b   : > { %p690_p1 = pnand %p689_p0, %p688_p12  ;;  %p696_p3 = scmp.lt.u32.totalorder %s687_s8, %s962_s30 }
  0x4c   : > { %p695_p10 = por %p694_p6, %p693_p13 }
  0x4d   : > { %p691_p2 = pneg %p690_p1 }
  0x4e   : > { %p697_p7 = por %p696_p3, %p695_p10 }
  0x50   : > { %p698_p9 = pnand %p697_p7, %p691_p2 }
  0x52   : > { %701 = shalt.err (!%p698_p9)
}
  0x53   : > { %s702_s20 = scalar_lea.vmem %s964_s6, 512  ;;  %s793_s29 = smov [#allocation2]  }
  0x54   : > { %p703_p12 = scmp.ne.s32.totalorder %s964_s6, %s702_s20  ;;  %s707_s5 = sshll.u32 %s793_s29, 4  ;;  %s708_s5 = int_to_ptr.vmem [resolvable:$false] %s707_s5 }
  0x55   : > { %s709_s9 = scalar_lea.vmem %s708_s5, 1024  ;;  %p710_p4 = scmp.lt.s32.totalorder %s964_s6, %s708_s5 }
  0x56   : > { %p705_p1 = pnand %p703_p12, %p689_p0  ;;  %p711_p13 = scmp.lt.s32.totalorder %s709_s9, %s702_s20 }
  0x58   : > { %p706_p5 = pneg %p705_p1  ;;  %p712_p6 = por %p711_p13, %p710_p4 }
  0x5a   : > { %p713_p10 = pnand %p712_p6, %p706_p5 }
  0x5c   : > { %716 = shalt.err (!%p713_p10)
}
  0x5d   : > { %581 = dma.hbm_to_vmem [thread:$0]  (!%p966_p11), %s962_s30, 512, %s964_s6, %s970_s7, %s791_s11, %s791_s11, %s792_s12  }
  0x5e   : > { %206 = sbr.rel (%p863_p8) target bundleno = 408 (0x198), region = 36  ;;  %s1004_s8 = sand.u32 (!%p863_p8), 1, %s779_s16  }
  0x5f   : > { %s517_s10 = sshll.u32 (!%p863_p8), %s1004_s8, 5  ;;  %s209_s24 = scalar_lea.sflag (!%p863_p8), [#allocation3], %s1004_s8 }
  0x60   : > { %s1010_s25 = scalar_lea.vmem (!%p863_p8), [#allocation2], %s517_s10  ;;  %p1110_p4 = scmp.ne.s32.totalorder (!%p863_p8), %s1103_s21, 0 }
  0x65   : > { %762 = dma.done.wait (%p1110_p4), %s209_s24, 512  }
  0x66   : > { %764 = vsyncadd (%p1110_p4), %s209_s24, 4294966784  ;;  %p1111_p5 = scmp.eq.s32.totalorder %s844_s19, 0 }
  0x68   : > { %766 = dma.done.wait (%p1111_p5), [#allocation6], 4096   ;;  %p1112_p8 = pmov %p1111_p5 }
  0x69   : > { %v248_v0 = vld [vmem:[#allocation7] sm:$0xff]  ;;  %v249_v1 = vld [vmem:[#allocation7 + $0x8] sm:$0xff]  ;;  %v250_v4 = vld [vmem:[#allocation7 + $0x10] sm:$0xff]  ;;  %v794_v6 = vmov 0.0   ;;  %s244_s11 = scalar_lea.vmem [#allocation8], %s517_s10  ;;  %s528_s30 = sshll.u32 %s844_s19, 9 }
  0x6a   : > { %768 = vsyncadd (%p1112_p8), [#allocation6], 4294963200  ;;  %v296_v2 = vld [vmem:[#allocation5] sm:$0xff]  ;;  %vm264_vm0 = vcmp.ge.u32.totalorder %v248_v0, 2147483648  ;;  %vm265_vm1 = vcmp.ge.u32.totalorder %v249_v1, 2147483648  ;;  %v297_v3 = vld [vmem:[#allocation5 + $0x8] sm:$0xff]  ;;  %s1051_s28 = scalar_lea.hbm %s1099_s4, %s528_s30 }
  0x6b   : > { %v251_v5 = vld [vmem:[#allocation7 + $0x18] sm:$0xff]  ;;  %v280_v7 = vsel %vm264_vm0, 2.0, %v794_v6  ;;  %v281_v8 = vsel %vm265_vm1, 2.0, %v794_v6  ;;  %vm266_vm2 = vcmp.ge.u32.totalorder %v250_v4, 2147483648  ;;  %v298_v9 = vld [vmem:[#allocation5 + $0x10] sm:$0xff]  ;;  %v252_v15 = vld [vmem:[#allocation7 + $0x20] sm:$0xff] }
  0x6c   : > { %vm267_vm3 = vcmp.ge.u32.totalorder %v251_v5, 2147483648  ;;  %v299_v10 = vld [vmem:[#allocation5 + $0x18] sm:$0xff]  ;;  %v312_v11 = vmul.f32 %v296_v2, %v280_v7  ;;  %v313_v12 = vmul.f32 %v297_v3, %v281_v8  ;;  %v282_v13 = vsel %vm266_vm2, 2.0, %v794_v6  ;;  %v253_v16 = vld [vmem:[#allocation7 + $0x28] sm:$0xff]  ;;  %v300_v23 = vld [vmem:[#allocation5 + $0x20] sm:$0xff]  ;;  %s416_s12 = sshll.u32 %s244_s11, 4  ;;  %s1046_s12 = int_to_ptr.vmem [resolvable:$true] %s416_s12 }
  0x6d   : > { %v283_v14 = vsel %vm267_vm3, 2.0, %v794_v6  ;;  %v314_v17 = vmul.f32 %v298_v9, %v282_v13  ;;  %vm268_vm4 = vcmp.ge.u32.totalorder %v252_v15, 2147483648  ;;  %vm269_vm5 = vcmp.ge.u32.totalorder %v253_v16, 2147483648  ;;  %v301_v24 = vld [vmem:[#allocation5 + $0x28] sm:$0xff]  ;;  %v254_v25 = vld [vmem:[#allocation7 + $0x30] sm:$0xff]  ;;  %v255_v26 = vld [vmem:[#allocation7 + $0x38] sm:$0xff] }
  0x6e   : > { %v315_v18 = vmul.f32 %v299_v10, %v283_v14  ;;  %v328_v19 = vpack.c.bf16 %v313_v12, %v312_v11  ;;  %v284_v21 = vsel %vm268_vm4, 2.0, %v794_v6  ;;  %v285_v22 = vsel %vm269_vm5, 2.0, %v794_v6  ;;  %v336_v29 = vld [vmem:[%s1010_s25] sm:$0xff]  ;;  %v337_v30 = vld [vmem:[%s1010_s25 + $0x8] sm:$0xff]  ;;  %v302_v34 = vld [vmem:[#allocation5 + $0x30] sm:$0xff]  ;;  %s403_s19 = scalar_lea.sflag [#allocation4], %s1004_s8 }
  0x6f   : > { %v316_v27 = vmul.f32 %v300_v23, %v284_v21  ;;  %v317_v28 = vmul.f32 %v301_v24, %v285_v22  ;;  %vm270_vm6 = vcmp.ge.u32.totalorder %v254_v25, 2147483648  ;;  %vm271_vm7 = vcmp.ge.u32.totalorder %v255_v26, 2147483648  ;;  %v303_v35 = vld [vmem:[#allocation5 + $0x38] sm:$0xff]  ;;  %v256_v37 = vld [vmem:[#allocation7 + $0x40] sm:$0xff]  ;;  %v257_v38 = vld [vmem:[#allocation7 + $0x48] sm:$0xff]  ;;  %s717_s27 = scalar_lea.vmem %s1046_s12, 512 }
  0x70   : > { %v329_v20 = vpack.c.bf16 %v315_v18, %v314_v17  ;;  %539 = vmatprep.subr.bf16.mxu0 %v328_v19  ;;  %v286_v32 = vsel %vm270_vm6, 2.0, %v794_v6  ;;  %v287_v33 = vsel %vm271_vm7, 2.0, %v794_v6  ;;  %v340_v36 = vpack.c.bf16 %v337_v30, %v336_v29  ;;  %v304_v44 = vld [vmem:[#allocation5 + $0x40] sm:$0xff]  ;;  %v305_v45 = vld [vmem:[#allocation5 + $0x48] sm:$0xff]  ;;  %v258_v46 = vld [vmem:[#allocation7 + $0x50] sm:$0xff]  ;;  %p718_p11 = scmp.ne.s32.totalorder %s1046_s12, %s717_s27  ;;  %p1113_p0 = scmp.ne.s32.totalorder %s1108_s13, 0 }
  0x71   : > { %540 = vmatpush3.bf16.xpose.msra.mxu0 %v328_v19  ;;  %v330_v31 = vpack.c.bf16 %v317_v28, %v316_v27  ;;  %v318_v39 = vmul.f32 %v302_v34, %v286_v32  ;;  %v319_v40 = vmul.f32 %v303_v35, %v287_v33  ;;  %vm272_vm8 = vcmp.ge.u32.totalorder %v256_v37, 2147483648  ;;  %v259_v47 = vld [vmem:[#allocation7 + $0x58] sm:$0xff]  ;;  %v306_v53 = vld [vmem:[#allocation5 + $0x50] sm:$0xff]  ;;  %v260_v55 = vld [vmem:[#allocation7 + $0x60] sm:$0xff]  ;;  %s795_s20 = smov [#allocation8]  }
  0x72   : > { %541 = vmatprep.subr.bf16.mxu0 %v329_v20  ;;  %555 = vmatprep.mubr.bf16.mxu0 %v340_v36  ;;  %vm273_vm9 = vcmp.ge.u32.totalorder %v257_v38, 2147483648  ;;  %v288_v42 = vsel %vm272_vm8, 2.0, %v794_v6  ;;  %vm274_vm10 = vcmp.ge.u32.totalorder %v258_v46, 2147483648  ;;  %vm275_vm11 = vcmp.ge.u32.totalorder %v259_v47, 2147483648  ;;  %v307_v54 = vld [vmem:[#allocation5 + $0x58] sm:$0xff]  ;;  %v261_v56 = vld [vmem:[#allocation7 + $0x68] sm:$0xff]  ;;  %p719_p2 = pnand %p718_p11, %p1113_p0 }
  0x73   : > { %v331_v41 = vpack.c.bf16 %v319_v40, %v318_v39  ;;  %v289_v43 = vsel %vm273_vm9, 2.0, %v794_v6  ;;  %v320_v48 = vmul.f32 %v304_v44, %v288_v42  ;;  %v290_v51 = vsel %vm274_vm10, 2.0, %v794_v6  ;;  %v308_v62 = vld [vmem:[#allocation5 + $0x60] sm:$0xff]  ;;  %v309_v63 = vld [vmem:[#allocation5 + $0x68] sm:$0xff]  ;;  %v262_v0 = vld [vmem:[#allocation7 + $0x70] sm:$0xff]  ;;  %s721_s29 = sshll.u32 %s795_s20, 4  ;;  %s722_s29 = int_to_ptr.vmem [resolvable:$false] %s721_s29 }
  0x74   : > { %v321_v49 = vmul.f32 %v305_v45, %v289_v43  ;;  %v291_v52 = vsel %vm275_vm11, 2.0, %v794_v6  ;;  %v322_v57 = vmul.f32 %v306_v53, %v290_v51  ;;  %vm276_vm12 = vcmp.ge.u32.totalorder %v260_v55, 2147483648  ;;  %v263_v1 = vld [vmem:[#allocation7 + $0x78] sm:$0xff]  ;;  %v310_v8 = vld [vmem:[#allocation5 + $0x70] sm:$0xff]  ;;  %p720_p3 = pneg %p719_p2  ;;  %s723_s5 = scalar_lea.vmem %s722_s29, 1024 }
  0x75   : > { %v323_v58 = vmul.f32 %v307_v54, %v291_v52  ;;  %vm277_vm13 = vcmp.ge.u32.totalorder %v261_v56, 2147483648  ;;  %v292_v60 = vsel %vm276_vm12, 2.0, %v794_v6  ;;  %vm278_vm14 = vcmp.ge.u32.totalorder %v262_v0, 2147483648  ;;  %v311_v9 = vld [vmem:[#allocation5 + $0x78] sm:$0xff]  ;;  %v338_v13 = vld [vmem:[%s1010_s25 + $0x10] sm:$0xff]  ;;  %p724_p7 = scmp.lt.s32.totalorder %s1046_s12, %s722_s29  ;;  %p725_p9 = scmp.lt.s32.totalorder %s723_s5, %s717_s27 }
  0x76   : > { %v332_v50 = vpack.c.bf16 %v321_v49, %v320_v48  ;;  %v293_v61 = vsel %vm277_vm13, 2.0, %v794_v6  ;;  %v324_v2 = vmul.f32 %v308_v62, %v292_v60  ;;  %vm279_vm15 = vcmp.ge.u32.totalorder %v263_v1, 2147483648  ;;  %v339_v14 = vld [vmem:[%s1010_s25 + $0x18] sm:$0xff] }
  0x77   : > { %v333_v59 = vpack.c.bf16 %v323_v58, %v322_v57  ;;  %v325_v3 = vmul.f32 %v309_v63, %v293_v61  ;;  %v294_v5 = vsel %vm278_vm14, 2.0, %v794_v6  ;;  %v295_v7 = vsel %vm279_vm15, 2.0, %v794_v6  ;;  %v521_v6 = vld [vmem:[%s1098_s3] ss:$0 sm:$0xff]  ;;  %p726_p12 = por %p725_p9, %p724_p7 }
  0x78   : > { %v326_v10 = vmul.f32 %v310_v8, %v294_v5  ;;  %v327_v11 = vmul.f32 %v311_v9, %v295_v7  ;;  %v341_v15 = vpack.c.bf16 %v339_v14, %v338_v13 }
  0x79   : > { %542 = vmatpush3.bf16.xpose.msra.mxu0 %v329_v20  ;;  %v334_v4 = vpack.c.bf16 %v325_v3, %v324_v2  ;;  %p727_p1 = pnand %p726_p12, %p720_p3 }
  0x7a   : > { %543 = vmatprep.subr.bf16.mxu0 %v330_v31  ;;  %v335_v12 = vpack.c.bf16 %v327_v11, %v326_v10 }
  0x81   : > { %544 = vmatpush3.bf16.xpose.msra.mxu0 %v330_v31 }
  0x82   : > { %545 = vmatprep.subr.bf16.mxu0 %v331_v41 }
  0x89   : > { %546 = vmatpush3.bf16.xpose.msra.mxu0 %v331_v41 }
  0x8a   : > { %547 = vmatprep.subr.bf16.mxu0 %v332_v50 }
  0x91   : > { %548 = vmatpush3.bf16.xpose.msra.mxu0 %v332_v50 }
  0x92   : > { %549 = vmatprep.subr.bf16.mxu0 %v333_v59 }
  0x99   : > { %550 = vmatpush3.bf16.xpose.msra.mxu0 %v333_v59 }
  0x9a   : > { %551 = vmatprep.subr.bf16.mxu0 %v334_v4 }
  0xa1   : > { %552 = vmatpush3.bf16.xpose.msra.mxu0 %v334_v4 }
  0xa2   : > { %553 = vmatprep.subr.bf16.mxu0 %v335_v12 }
  0xa9   : > { %554 = vmatpush3.bf16.xpose.msra.mxu0 %v335_v12 }
  0xb0   : > { %556 = vmatmul.mubr.bf16.vlgmr.msra.gmra.mrb[0].mxu0 %v341_v15 }
 0x183   : > { %v557_v16 = vpop.f32.mrb[0].mxu0 }
 0x184   : > { %v392_v17 = vadd.f32 %v557_v16, %v521_v6  ;;  %v383_v18 = vpop.f32.mrb[1].mxu0 }
 0x185   : > { %v384_v19 = vadd.f32 %v521_v6, %v383_v18  ;;  %v558_v20 = vpop.f32.mrb[2].mxu0 }
 0x186   : > { %400 = vst [vmem:[%s244_s11 + $0x10] sm:$0xff] %v392_v17  ;;  %v395_v21 = vadd.f32 %v558_v20, %v521_v6  ;;  %v386_v22 = vpop.f32.mrb[3].mxu0 }
 0x187   : > { %398 = vst [vmem:[%s244_s11] sm:$0xff] %v384_v19  ;;  %v387_v23 = vadd.f32 %v521_v6, %v386_v22 }
 0x188   : > { %401 = vst [vmem:[%s244_s11 + $0x18] sm:$0xff] %v395_v21 }
 0x189   : > { %399 = vst [vmem:[%s244_s11 + $0x8] sm:$0xff] %v387_v23 }
 0x18a   : > { %730 = shalt.err (!%p727_p1)
}
 0x18b   : > { %s731_s9 = scalar_lea.hbm %s1051_s28, 512  ;;  %s735_s25 = scalar_lea.hbm %s1099_s4, 1024 }
 0x18c   : > { %p732_p13 = scmp.ne.s32.totalorder %s1051_s28, %s731_s9  ;;  %p736_p4 = scmp.lt.u32.totalorder %s1051_s28, %s1099_s4 }
 0x18d   : > { %p737_p5 = scmp.lt.u32.totalorder %s735_s25, %s731_s9  ;;  %p739_p11 = scmp.lt.u32.totalorder %s731_s9, %s1051_s28 }
 0x18e   : > { %p733_p6 = pnand %p732_p13, %p1113_p0 }
 0x18f   : > { %p738_p8 = por %p737_p5, %p736_p4 }
 0x190   : > { %p734_p10 = pneg %p733_p6 }
 0x191   : > { %p740_p2 = por %p739_p11, %p738_p8 }
 0x193   : > { %p741_p3 = pnand %p740_p2, %p734_p10 }
 0x195   : > { %744 = shalt.err (!%p741_p3)
}
 0x196   : > { %s796_s11 = smov 128   ;;  %s797_s30 = smov 8  }
 0x197   : > { %569 = dma.vmem_to_hbm [thread:$0]  (%p1113_p0), %s1046_s12, 512, %s1051_s28, %s403_s19, %s796_s11, %s796_s11, %s797_s30  }
 0x198 PF: > { %s431_s6 = sand.u32 1, %s775_s15   ;;  %p1114_p7 = scmp.ne.s32.totalorder %s1104_s22, 0 }
 0x199   : > { %p1115_p9 = scmp.ge.s32.totalorder %s787_s18, 2  ;;  %s432_s7 = scalar_lea.sflag [#allocation4], %s431_s6 }
 0x19b   : > { %p583_p12 = pnand %p1115_p9, %p1114_p7 }
 0x19d   : > { %770 = dma.done.wait (!%p583_p12), %s432_s7, 512  }
 0x19e   : > { %772 = vsyncadd (!%p583_p12), %s432_s7, 4294966784  ;;  %p18_p1 = scmp.ge.s32.totalorder %s939_s26, 4   ;;  %s1116_s15 = smov %s779_s16 }
 0x19f   : > { %s1117_s16 = smov %s783_s17  ;;  %s1118_s17 = smov %s955_s14 }
 0x1a0   : > { %s1119_s18 = smov %s939_s26  ;;  %20 = sbr.rel (!%p18_p1) target bundleno = 6 (0x6), region = 89 }
 0x1a7   :  { %437 = vsyncpa [#allocation3], 1 }
 0x1a8   :  { %439 = vsyncpa [#allocation3 + $0x1], 1 }
 0x1a9   :  { %440 = vsyncpa [#allocation6], 1 }
 0x1aa   :  { %441 = vsyncpa [#allocation4], 1 }
 0x1ab   :  { %443 = vsyncpa [#allocation4 + $0x1], 1 }

</bundles_post_ra>
